<compile_context>
chip_gen: v7x
topology: tpu7x:2x2x1
jax: 0.10.0
libtpu: 0.0.40
codegen_flags: <defaults>
</compile_context>

<pallas_src>
import functools
import math

import jax
import jax.numpy as jnp
import numpy as np
from jax.experimental import pallas as pl
from jax.experimental.pallas import tpu as pltpu

EPS = 1e-5
MXU_DTYPE = jnp.bfloat16      # matmul operand dtype (f32 accumulation on the MXU)
STREAM_DTYPE = jnp.bfloat16   # inter-kernel activation / scores streams in HBM


# ----------------------------------------------------------------------------
# In-kernel math helpers (VPU / EUP, f32)
# ----------------------------------------------------------------------------
def _gelu(x):
    # tanh-form GELU: the transcendental goes to the EUP instead of a long VPU
    # polynomial; matches erf-GELU to ~1e-3 absolute.
    c = math.sqrt(2.0 / math.pi)
    return 0.5 * x * (1.0 + jnp.tanh(c * (x + 0.044715 * x * x * x)))


def _emit_tile_stats(z, mean_ref, m2_ref, n_valid_rows, padded):
    """Per-tile BatchNorm partials: masked (mean, M2) for Chan-style combination."""
    rows = z.shape[0]
    if padded:
        pid = pl.program_id(0)
        flat = jax.lax.broadcasted_iota(jnp.int32, (rows, 1), 0) + pid * rows
        mask = (flat < n_valid_rows).astype(jnp.float32)
        cnt = jnp.maximum(jnp.sum(mask, axis=0, keepdims=True), 1.0)      # (1,1)
        mean = jnp.sum(z * mask, axis=0, keepdims=True) / cnt             # (1,D)
        d = (z - mean) * mask
    else:
        mean = jnp.mean(z, axis=0, keepdims=True)
        d = z - mean
    mean_ref[0] = mean
    m2_ref[0] = jnp.sum(d * d, axis=0, keepdims=True)


# ----------------------------------------------------------------------------
# Hardware-aware sizing
# ----------------------------------------------------------------------------
def _hw_config():
    """(scoped vmem limit, minimum grid length)."""
    try:
        vmem_phys = int(pltpu.get_tpu_info().vmem_capacity_bytes)
    except Exception:
        vmem_phys = 64 * 1024 * 1024                 # conservative (v7x-sized)
    vmem_limit = int(vmem_phys * 3 // 4)              # ~96 MiB v5e/v6e, ~48 MiB v7x
    # Small-VMEM parts (v7x class) have 2 TensorCores: need >=2 grid steps per core
    # so BlockSpec pipelining has something to prefetch; 1-TC parts only need >=2.
    min_grid = 4 if vmem_phys <= 80 * 1024 * 1024 else 2
    return vmem_limit, min_grid


def _pick_tile(N, P, D, H, F, vmem_limit, min_grid):
    """Sequences per tile: largest that fits the scoped-VMEM budget (double-buffered
    bf16 streams + f32 in-kernel temps + replicated weights) while keeping >= min_grid
    grid steps for pipelining / TensorCore sharding."""
    # Pipelined HBM<->VMEM streams (bf16, 2 buffers each): x/z activations, prev/new scores.
    stream = 2 * 2 * 2 * (P * D + H * P * P)
    # In-kernel f32 temporaries, worst of attention (xn, qkv(3D), ctx, attn_out, z,
    # one head's PxP scores) and FFN (z, src, hidden(F), ff, z2).
    temps = 4 * P * max(7 * D + P, 4 * D + F)
    per_seq = stream + temps
    # Replicated weights (bf16, 2 buffers) + headroom for biases / stat blocks / misc.
    weights = 2 * 2 * max(4 * D * D, 2 * D * F)
    budget = max(vmem_limit - weights - (8 << 20), 1 << 20)
    tn = max(1, min(N, budget // per_seq))
    tn = min(tn, max(1, -(-N // min_grid)))           # keep >= min_grid steps
    return int(tn)


def _compiler_params(vmem_limit):
    return pltpu.CompilerParams(dimension_semantics=("parallel",),
                                vmem_limit_bytes=int(vmem_limit))


def _seq_spec(tn, P, last):
    return pl.BlockSpec((tn, P, last), lambda i: (i, 0, 0))


def _rep_spec(shape):
    nd = len(shape)
    return pl.BlockSpec(shape, lambda i, _nd=nd: (0,) * _nd)


# ----------------------------------------------------------------------------
# Kernel 1: patch projection + positional encoding (row-tiled matmul)
# ----------------------------------------------------------------------------
def _proj_pos_kernel(x_ref, w_ref, b_ref, pos_ref, o_ref):
    tn, P, L = x_ref.shape
    D = w_ref.shape[1]
    x2 = x_ref[...].reshape(tn * P, L).astype(MXU_DTYPE)
    y = jnp.dot(x2, w_ref[...], preferred_element_type=jnp.float32)
    o_ref[...] = (y.reshape(tn, P, D) + b_ref[...] + pos_ref[...]).astype(o_ref.dtype)


def project_and_add_pos(x, w, b, pos, tn, vmem_limit):
    Np, P, L = x.shape
    D = w.shape[1]
    return pl.pallas_call(
        _proj_pos_kernel,
        out_shape=jax.ShapeDtypeStruct((Np, P, D), STREAM_DTYPE),
        grid=(Np // tn,),
        in_specs=[_seq_spec(tn, P, L), _rep_spec((L, D)),
                  _rep_spec((1, D)), _rep_spec((P, D))],
        out_specs=_seq_spec(tn, P, D),
        compiler_params=_compiler_params(vmem_limit),
    )(x, w.astype(MXU_DTYPE), b, pos)


# ----------------------------------------------------------------------------
# Kernel 2: attention block (folded input-BN, fused QKV, residual scores, Wo)
#           + BN1 partials
# ----------------------------------------------------------------------------
def _attn_kernel(*refs, n_heads, n_valid_rows, emit_scores, has_prev, padded):
    it = iter(refs)
    x_ref, mu_ref, inv_ref, g_ref, be_ref = (next(it) for _ in range(5))
    prev_ref = next(it) if has_prev else None
    wqkv_ref, bqkv_ref, wo_ref, bo_ref = (next(it) for _ in range(4))
    z_ref = next(it)
    s_ref = next(it) if emit_scores else None
    mean_ref = next(it)
    m2_ref = next(it)
    ctx_ref = next(it)                                  # VMEM scratch (tn*P, D) f32

    tn, P, D = x_ref.shape
    H = n_heads
    dk = D // H

    # Fold the previous layer's second BatchNorm (identity params for layer 0).
    xn = (x_ref[...].astype(jnp.float32) - mu_ref[...]) * inv_ref[...] * g_ref[...] + be_ref[...]
    x2 = xn.reshape(tn * P, D)

    # One fused (tn*P, D) @ (D, 3D) matmul; 1/sqrt(dk) already folded into Wq/bq.
    qkv = jnp.dot(x2.astype(MXU_DTYPE), wqkv_ref[...],
                  preferred_element_type=jnp.float32) + bqkv_ref[...]

    for h in range(H):                                   # static unroll over heads
        q = qkv[:, h * dk:(h + 1) * dk].reshape(tn, P, dk).astype(MXU_DTYPE)
        k = qkv[:, D + h * dk:D + (h + 1) * dk].reshape(tn, P, dk).astype(MXU_DTYPE)
        v = qkv[:, 2 * D + h * dk:2 * D + (h + 1) * dk].reshape(tn, P, dk).astype(MXU_DTYPE)
        s = jnp.einsum('bqd,bkd->bqk', q, k, preferred_element_type=jnp.float32)
        if has_prev:                                     # residual attention (f32 add)
            s = s + prev_ref[:, :, h * P:(h + 1) * P].astype(jnp.float32)
        if emit_scores:                                  # stream straight to the output ref
            s_ref[:, :, h * P:(h + 1) * P] = s.astype(s_ref.dtype)
        m = jnp.max(s, axis=-1, keepdims=True)
        e = jnp.exp(s - m)
        a = e * pl.reciprocal(jnp.sum(e, axis=-1, keepdims=True), approx=True)
        ctx = jnp.einsum('bqk,bkd->bqd', a.astype(MXU_DTYPE), v,
                         preferred_element_type=jnp.float32)
        ctx_ref[:, h * dk:(h + 1) * dk] = ctx.reshape(tn * P, dk)

    # One assembled (tn*P, D) @ (D, D) output-projection matmul.
    attn_out = jnp.dot(ctx_ref[...].astype(MXU_DTYPE), wo_ref[...],
                       preferred_element_type=jnp.float32) + bo_ref[...]
    z = x2 + attn_out                                    # residual, pre-BN1 (f32)
    z_ref[...] = z.reshape(tn, P, D).astype(z_ref.dtype)
    _emit_tile_stats(z, mean_ref, m2_ref, n_valid_rows, padded)


def attention_block(x, mu_in, inv_in, g_in, be_in, prev, lp, n_heads, tn,
                    n_valid_rows, emit_scores, padded, vmem_limit):
    Np, P, D = x.shape
    H = n_heads
    G = Np // tn
    dk = D // H
    scale = 1.0 / math.sqrt(dk)

    in_specs = [_seq_spec(tn, P, D)] + [_rep_spec((1, D))] * 4
    args = [x, mu_in, inv_in, g_in, be_in]
    if prev is not None:
        in_specs.append(_seq_spec(tn, P, H * P))
        args.append(prev)
    in_specs += [_rep_spec((D, 3 * D)), _rep_spec((1, 3 * D)),
                 _rep_spec((D, D)), _rep_spec((1, D))]
    # Fused QKV weight/bias with the attention scale folded into the Q columns.
    wqkv = jnp.concatenate([lp['Wq'] * scale, lp['Wk'], lp['Wv']], axis=1).astype(MXU_DTYPE)
    bqkv = jnp.concatenate([lp['bq'] * scale, lp['bk'], lp['bv']], axis=1)
    args += [wqkv, bqkv, lp['Wo'].astype(MXU_DTYPE), lp['bo']]

    stat = jax.ShapeDtypeStruct((G, 1, D), jnp.float32)
    stat_spec = pl.BlockSpec((1, 1, D), lambda i: (i, 0, 0))
    out_shape = [jax.ShapeDtypeStruct((Np, P, D), STREAM_DTYPE)]
    out_specs = [_seq_spec(tn, P, D)]
    if emit_scores:
        out_shape.append(jax.ShapeDtypeStruct((Np, P, H * P), STREAM_DTYPE))
        out_specs.append(_seq_spec(tn, P, H * P))
    out_shape += [stat, stat]
    out_specs += [stat_spec, stat_spec]

    kernel = functools.partial(_attn_kernel, n_heads=H, n_valid_rows=n_valid_rows,
                               emit_scores=emit_scores, has_prev=prev is not None,
                               padded=padded)
    return pl.pallas_call(
        kernel,
        out_shape=tuple(out_shape),
        grid=(G,),
        in_specs=in_specs,
        out_specs=tuple(out_specs),
        scratch_shapes=[pltpu.VMEM((tn * P, D), jnp.float32)],
        compiler_params=_compiler_params(vmem_limit),
    )(*args)


# ----------------------------------------------------------------------------
# Kernel 3: BN1-apply + FFN (Linear -> GELU -> Linear) + BN2 partials
# ----------------------------------------------------------------------------
def _ffn_kernel(z_ref, mu_ref, inv_ref, g_ref, be_ref, w1_ref, b1_ref, w2_ref, b2_ref,
                z2_ref, mean_ref, m2_ref, *, n_valid_rows, padded):
    tn, P, D = z_ref.shape
    z = z_ref[...].astype(jnp.float32).reshape(tn * P, D)
    src = (z - mu_ref[...]) * inv_ref[...] * g_ref[...] + be_ref[...]       # BN1 apply
    h = jnp.dot(src.astype(MXU_DTYPE), w1_ref[...],
                preferred_element_type=jnp.float32) + b1_ref[...]
    h = _gelu(h)
    ff = jnp.dot(h.astype(MXU_DTYPE), w2_ref[...],
                 preferred_element_type=jnp.float32) + b2_ref[...]
    z2 = src + ff                                                           # residual, pre-BN2
    z2_ref[...] = z2.reshape(tn, P, D).astype(z2_ref.dtype)
    _emit_tile_stats(z2, mean_ref, m2_ref, n_valid_rows, padded)


def ffn_block(z1, mu1, inv1, g1, be1, lp, tn, n_valid_rows, padded, vmem_limit):
    Np, P, D = z1.shape
    F = lp['W1'].shape[1]
    G = Np // tn
    stat = jax.ShapeDtypeStruct((G, 1, D), jnp.float32)
    stat_spec = pl.BlockSpec((1, 1, D), lambda i: (i, 0, 0))
    kernel = functools.partial(_ffn_kernel, n_valid_rows=n_valid_rows, padded=padded)
    return pl.pallas_call(
        kernel,
        out_shape=(jax.ShapeDtypeStruct((Np, P, D), STREAM_DTYPE), stat, stat),
        grid=(G,),
        in_specs=[_seq_spec(tn, P, D)] + [_rep_spec((1, D))] * 4
                 + [_rep_spec((D, F)), _rep_spec((1, F)),
                    _rep_spec((F, D)), _rep_spec((1, D))],
        out_specs=(_seq_spec(tn, P, D), stat_spec, stat_spec),
        compiler_params=_compiler_params(vmem_limit),
    )(z1, mu1, inv1, g1, be1,
      lp['W1'].astype(MXU_DTYPE), lp['b1'], lp['W2'].astype(MXU_DTYPE), lp['b2'])


# ----------------------------------------------------------------------------
# Kernel 4: final BatchNorm apply (BN2 of the last layer; earlier BN2s are folded
# into the next layer's attention kernel)
# ----------------------------------------------------------------------------
def _bn_apply_kernel(z_ref, mu_ref, inv_ref, g_ref, be_ref, o_ref):
    z = z_ref[...].astype(jnp.float32)
    o_ref[...] = (z - mu_ref[...]) * inv_ref[...] * g_ref[...] + be_ref[...]


def bn_apply(z, mu, inv, g, be, tn, vmem_limit):
    Np, P, D = z.shape
    return pl.pallas_call(
        _bn_apply_kernel,
        out_shape=jax.ShapeDtypeStruct((Np, P, D), jnp.float32),
        grid=(Np // tn,),
        in_specs=[_seq_spec(tn, P, D)] + [_rep_spec((1, D))] * 4,
        out_specs=_seq_spec(tn, P, D),
        compiler_params=_compiler_params(vmem_limit),
    )(z, mu, inv, g, be)


# ----------------------------------------------------------------------------
# Stats finalize (Chan parallel combination of per-tile mean/M2 -> biased var)
# ----------------------------------------------------------------------------
def _finalize_stats(means, m2s, counts_np, total):
    cw = jnp.asarray(counts_np, jnp.float32).reshape(-1, 1, 1)     # (G,1,1)
    mu = jnp.sum(cw * means, axis=0) / total                       # (1,D)
    m2 = jnp.sum(m2s, axis=0) + jnp.sum(cw * (means - mu) ** 2, axis=0)
    var = m2 / total
    inv = jax.lax.rsqrt(jnp.maximum(var, 0.0) + EPS)
    return mu, inv


# ----------------------------------------------------------------------------
# Full forward
# ----------------------------------------------------------------------------
def patchtst_forward(inputs, params, n_heads):
    B, P, C, L = inputs.shape
    D = params['W_proj'].shape[1]
    F = params['layers'][0]['W1'].shape[1]
    H = n_heads
    N = B * C

    vmem_limit, min_grid = _hw_config()
    tn = _pick_tile(N, P, D, H, F, vmem_limit, min_grid)
    G = -(-N // tn)
    N_pad = G * tn
    padded = N_pad != N
    n_valid_rows = N * P
    counts = (np.clip(N - np.arange(G) * tn, 0, tn) * P).astype(np.float32)
    total = float(N * P)

    x = jnp.transpose(inputs, (0, 2, 1, 3)).reshape(N, P, L)        # [N, P, L]
    if padded:
        x = jnp.pad(x, ((0, N_pad - N), (0, 0), (0, 0)))            # dummy sequences

    z = project_and_add_pos(x, params['W_proj'], params['b_proj'], params['pos'],
                            tn, vmem_limit)

    # Input normalization folded into each layer's attention kernel (identity for layer 0).
    mu_in = jnp.zeros((1, D), jnp.float32)
    inv_in = jnp.ones((1, D), jnp.float32)
    g_in = jnp.ones((1, D), jnp.float32)
    be_in = jnp.zeros((1, D), jnp.float32)

    scores = None                                                   # residual-attention state
    n_layers = len(params['layers'])
    for li, lp in enumerate(params['layers']):
        emit = (li + 1) < n_layers                                  # last layer: scores are dead
        outs = attention_block(z, mu_in, inv_in, g_in, be_in, scores, lp, H, tn,
                               n_valid_rows, emit, padded, vmem_limit)
        if emit:
            z1, scores, m1, q1 = outs
        else:
            z1, m1, q1 = outs
            scores = None
        mu1, inv1 = _finalize_stats(m1, q1, counts, total)
        z, m2, q2 = ffn_block(z1, mu1, inv1, lp['g1'], lp['be1'], lp, tn,
                              n_valid_rows, padded, vmem_limit)
        mu2, inv2 = _finalize_stats(m2, q2, counts, total)
        mu_in, inv_in, g_in, be_in = mu2, inv2, lp['g2'], lp['be2']

    y = bn_apply(z, mu_in, inv_in, g_in, be_in, tn, vmem_limit)
    y = y[:N].reshape(B, C, P, D)
    # [B, C, P, D] -> permute(0,1,3,2) -> [B, C, D, P]
    return jnp.transpose(y, (0, 1, 3, 2))


# ----------------------------------------------------------------------------
# Deterministic parameter construction (shapes from the module __init__)
# ----------------------------------------------------------------------------
def _linear_init(key, fan_in, fan_out):
    kw, kb = jax.random.split(key)
    bound = 1.0 / math.sqrt(fan_in)
    w = jax.random.uniform(kw, (fan_in, fan_out), jnp.float32, -bound, bound)
    b = jax.random.uniform(kb, (1, fan_out), jnp.float32, -bound, bound)
    return w, b


def init_params(key, patch_len, num_patches, model_dim, ff_dim, num_layers):
    keys = jax.random.split(key, 2 + num_layers)
    W_proj, b_proj = _linear_init(keys[0], patch_len, model_dim)
    pos = jax.random.uniform(keys[1], (num_patches, model_dim), jnp.float32, -0.02, 0.02)
    layers = []
    for i in range(num_layers):
        lk = jax.random.split(keys[2 + i], 6)
        Wq, bq = _linear_init(lk[0], model_dim, model_dim)
        Wk, bk = _linear_init(lk[1], model_dim, model_dim)
        Wv, bv = _linear_init(lk[2], model_dim, model_dim)
        Wo, bo = _linear_init(lk[3], model_dim, model_dim)
        W1, b1 = _linear_init(lk[4], model_dim, ff_dim)
        W2, b2 = _linear_init(lk[5], ff_dim, model_dim)
        layers.append(dict(
            Wq=Wq, bq=bq, Wk=Wk, bk=bk, Wv=Wv, bv=bv, Wo=Wo, bo=bo,
            g1=jnp.ones((1, model_dim), jnp.float32), be1=jnp.zeros((1, model_dim), jnp.float32),
            W1=W1, b1=b1, W2=W2, b2=b2,
            g2=jnp.ones((1, model_dim), jnp.float32), be2=jnp.zeros((1, model_dim), jnp.float32)))
    return dict(W_proj=W_proj, b_proj=b_proj, pos=pos, layers=layers)


# ----------------------------------------------------------------------------
# Pure-JAX f32 reference (exact erf GELU) for the correctness check
# ----------------------------------------------------------------------------
def _ref_layer(x, prev, lp, H):
    N, P, D = x.shape
    dk = D // H
    x2 = x.reshape(N * P, D)
    q = (x2 @ lp['Wq'] + lp['bq'][0]).reshape(N, P, H, dk).transpose(0, 2, 1, 3)
    k = (x2 @ lp['Wk'] + lp['bk'][0]).reshape(N, P, H, dk).transpose(0, 2, 1, 3)
    v = (x2 @ lp['Wv'] + lp['bv'][0]).reshape(N, P, H, dk).transpose(0, 2, 1, 3)
    s = jnp.einsum('nhqd,nhkd->nhqk', q, k) / math.sqrt(dk)
    if prev is not None:
        s = s + prev
    a = jax.nn.softmax(s, axis=-1)
    ctx = jnp.einsum('nhqk,nhkd->nhqd', a, v).transpose(0, 2, 1, 3).reshape(N * P, D)
    src = x2 + ctx @ lp['Wo'] + lp['bo'][0]

    def bn(z, g, b):
        mu = jnp.mean(z, axis=0, keepdims=True)
        var = jnp.mean((z - mu) ** 2, axis=0, keepdims=True)
        return (z - mu) / jnp.sqrt(var + EPS) * g + b

    src = bn(src, lp['g1'][0], lp['be1'][0])
    gelu = lambda t: 0.5 * t * (1.0 + jax.scipy.special.erf(t / math.sqrt(2.0)))
    ff = gelu(src @ lp['W1'] + lp['b1'][0]) @ lp['W2'] + lp['b2'][0]
    src = bn(src + ff, lp['g2'][0], lp['be2'][0])
    return src.reshape(N, P, D), s


def reference_forward(inputs, params, n_heads):
    B, P, C, L = inputs.shape
    x = jnp.einsum('bpcl,ld->bpcd', inputs, params['W_proj']) + params['b_proj'][0]
    D = params['W_proj'].shape[1]
    x = jnp.transpose(x, (0, 2, 1, 3)).reshape(B * C, P, D) + params['pos']
    scores = None
    for lp in params['layers']:
        x, scores = _ref_layer(x, scores, lp, n_heads)
    return jnp.transpose(x.reshape(B, C, P, D), (0, 1, 3, 2))


# ----------------------------------------------------------------------------
if __name__ == "__main__":
    # inputs: [batch=2, num_patches=8, channels=4, patch_len=16]
    B, P, C, L = 2, 8, 4, 16
    D, H, F, LAYERS = 32, 4, 64, 2

    key = jax.random.PRNGKey(0)
    k_in, k_par = jax.random.split(key)
    inputs = jax.random.normal(k_in, (B, P, C, L), jnp.float32)
    params = init_params(k_par, L, P, D, F, LAYERS)

    out = jax.block_until_ready(patchtst_forward(inputs, params, n_heads=H))
    assert out.shape == (B, C, D, P), out.shape

    ref = jax.block_until_ready(reference_forward(inputs, params, H))
    # Kernel uses bf16 MXU operands + bf16 inter-kernel streams (f32 accumulation) and
    # tanh-GELU; compare against the pure-f32 exact reference at a bf16 tolerance.
    np.testing.assert_allclose(np.asarray(out), np.asarray(ref), rtol=5e-2, atol=5e-2)

    print("KERNEL_OK")
</pallas_src>

<mosaic_0001>
module attributes {stable_mosaic.version = 11 : i64} {
  func.func @_proj_pos_kernel(%arg0: i32, %arg1: memref<2x8x16xf32, #tpu.memory_space<vmem>>, %arg2: memref<16x32xbf16, #tpu.memory_space<vmem>>, %arg3: memref<1x32xf32, #tpu.memory_space<vmem>>, %arg4: memref<8x32xf32, #tpu.memory_space<vmem>>, %arg5: memref<2x8x32xbf16, #tpu.memory_space<vmem>>) attributes {dimension_semantics = [#tpu.dimension_semantics<parallel>], iteration_bounds = array<i64: 4>, scalar_prefetch = 0 : i64, scratch_operands = 0 : i64, tpu.core_type = #tpu.core_type<tc>, window_params = [{transform_indices = @transform_0, window_bounds = array<i64: 2, 8, 16>}, {pipeline_mode = #tpu.pipeline_mode<synchronous>, transform_indices = @transform_1, window_bounds = array<i64: 16, 32>}, {pipeline_mode = #tpu.pipeline_mode<synchronous>, transform_indices = @transform_2, window_bounds = array<i64: 1, 32>}, {pipeline_mode = #tpu.pipeline_mode<synchronous>, transform_indices = @transform_3, window_bounds = array<i64: 8, 32>}, {transform_indices = @transform_4, window_bounds = array<i64: 2, 8, 32>}]} {
    %c0 = arith.constant 0 : index
    %c0_0 = arith.constant 0 : index
    %c0_1 = arith.constant 0 : index
    %0 = vector.load %arg1[%c0, %c0_0, %c0_1] : memref<2x8x16xf32, #tpu.memory_space<vmem>>, vector<2x8x16xf32>
    %1 = vector.shape_cast %0 : vector<2x8x16xf32> to vector<16x16xf32>
    %2 = arith.truncf %1 : vector<16x16xf32> to vector<16x16xbf16>
    %c0_2 = arith.constant 0 : index
    %c0_3 = arith.constant 0 : index
    %3 = vector.load %arg2[%c0_2, %c0_3] : memref<16x32xbf16, #tpu.memory_space<vmem>>, vector<16x32xbf16>
    %cst = arith.constant dense<0.000000e+00> : vector<16x32xf32>
    %4 = tpu.matmul %2, %3, %cst {dimension_numbers = #tpu.dot_dimension_numbers<[1], [0], [0], [1], [0, 0, 1, 1], [], []>} : vector<16x16xbf16>, vector<16x32xbf16>, vector<16x32xf32> -> vector<16x32xf32>
    %5 = vector.shape_cast %4 : vector<16x32xf32> to vector<2x8x32xf32>
    %c0_4 = arith.constant 0 : index
    %c0_5 = arith.constant 0 : index
    %6 = vector.load %arg3[%c0_4, %c0_5] : memref<1x32xf32, #tpu.memory_space<vmem>>, vector<1x32xf32>
    %7 = vector.shape_cast %6 : vector<1x32xf32> to vector<1x1x32xf32>
    %8 = vector.broadcast %7 : vector<1x1x32xf32> to vector<2x8x32xf32>
    %9 = arith.addf %5, %8 : vector<2x8x32xf32>
    %c0_6 = arith.constant 0 : index
    %c0_7 = arith.constant 0 : index
    %10 = vector.load %arg4[%c0_6, %c0_7] : memref<8x32xf32, #tpu.memory_space<vmem>>, vector<8x32xf32>
    %11 = vector.shape_cast %10 : vector<8x32xf32> to vector<1x8x32xf32>
    %12 = vector.broadcast %11 : vector<1x8x32xf32> to vector<2x8x32xf32>
    %13 = arith.addf %9, %12 : vector<2x8x32xf32>
    %14 = arith.truncf %13 : vector<2x8x32xf32> to vector<2x8x32xbf16>
    %c0_8 = arith.constant 0 : index
    %c0_9 = arith.constant 0 : index
    %c0_10 = arith.constant 0 : index
    %15 = vector.load %arg5[%c0_8, %c0_9, %c0_10] : memref<2x8x32xbf16, #tpu.memory_space<vmem>>, vector<2x8x32xbf16>
    tpu.vector_store %arg5[%c0_8, %c0_9, %c0_10], %14 {strides = array<i32>} : memref<2x8x32xbf16, #tpu.memory_space<vmem>>, vector<2x8x32xbf16>,
    return
  }
  func.func @transform_0(%arg0: i32) -> (i32, i32, i32) {
    %c0_i32 = arith.constant 0 : i32
    %c0_i32_0 = arith.constant 0 : i32
    %c0_i32_1 = arith.constant 0 : i32
    return %arg0, %c0_i32, %c0_i32_0 : i32, i32, i32
  }
  func.func @transform_1(%arg0: i32) -> (i32, i32) {
    %c0_i32 = arith.constant 0 : i32
    %c0_i32_0 = arith.constant 0 : i32
    %c0_i32_1 = arith.constant 0 : i32
    return %c0_i32, %c0_i32_0 : i32, i32
  }
  func.func @transform_2(%arg0: i32) -> (i32, i32) {
    %c0_i32 = arith.constant 0 : i32
    %c0_i32_0 = arith.constant 0 : i32
    %c0_i32_1 = arith.constant 0 : i32
    return %c0_i32, %c0_i32_0 : i32, i32
  }
  func.func @transform_3(%arg0: i32) -> (i32, i32) {
    %c0_i32 = arith.constant 0 : i32
    %c0_i32_0 = arith.constant 0 : i32
    %c0_i32_1 = arith.constant 0 : i32
    return %c0_i32, %c0_i32_0 : i32, i32
  }
  func.func @transform_4(%arg0: i32) -> (i32, i32, i32) {
    %c0_i32 = arith.constant 0 : i32
    %c0_i32_0 = arith.constant 0 : i32
    %c0_i32_1 = arith.constant 0 : i32
    return %arg0, %c0_i32, %c0_i32_0 : i32, i32, i32
  }
}

</mosaic_0001>

<bundles_post_ra>
// kernel: tpu_custom_call.1
= control target key start
LH: loop header
LB: loop body
LE: loop exit
PB: predicated region body
PF: predicated region fallthrough
CT: control target
= control target key end

     0   :  { %9 = vsyncpa [#allocation3], 0  ;;  %s864_s0 = inlined_call_operand.hbm [shape: f32[8,8,16], index: 0, kind: input, shape index: {}]   ;;  %s865_s1 = inlined_call_operand.hbm [shape: bf16[16,32], index: 1, kind: input, shape index: {}]   ;;  %s866_s2 = inlined_call_operand.vmem [shape: f32[1,32], index: 2, kind: input, shape index: {}]   ;;  %s867_s3 = inlined_call_operand.vmem [shape: f32[8,32], index: 3, kind: input, shape index: {}]   ;;  %s868_s4 = inlined_call_operand.hbm [shape: bf16[8,8,32], index: 4, kind: output, shape index: {}]  }
   0x1   :  { %11 = vsyncpa [#allocation3 + $0x1], 0 }
   0x2   :  { %12 = vsyncpa [#allocation6], 0 }
   0x3   :  { %13 = vsyncpa [#allocation4], 0 }
   0x4   :  { %15 = vsyncpa [#allocation4 + $0x1], 0  ;;  %s665_s15 = smov 0   ;;  %s667_s16 = smov 0  }
   0x5   :  { %s669_s17 = smov 0   ;;  %s671_s18 = smov 0  }
   0x6 LB: > { %s686_s19 = sadd.s32 4294967295, %s627_s18   ;;  %s404_s20 = sadd.s32 4294967294, %s627_s18   ;;  %s627_s18 = sphi %s671_s18, %s887_s18   ;;  %s623_s17 = sphi %s669_s17, %s886_s17   ;;  %s619_s16 = sphi %s667_s16, %s885_s16   ;;  %s615_s15 = sphi %s665_s15, %s884_s15  }
   0x7   : > { %p41_p0 = scmp.ne.s32.totalorder %s619_s16, %s615_s15  ;;  %p869_p1 = scmp.eq.s32.totalorder %s686_s19, 0 }
   0x8   : > { %p134_p3 = scmp.eq.s32.totalorder %s404_s20, 3  ;;  %p405_p5 = scmp.ge.s32.totalorder %s627_s18, 1 }
   0x9   : > { %p695_p4 = por %p869_p1, %p41_p0  ;;  %p141_p7 = scmp.lt.s32.totalorder %s627_s18, 5 }
   0xa   : > { %p700_p6 = por %p134_p3, %p41_p0  ;;  %s629_s24 = smov [#allocation5]  }
   0xb   : > { %s872_s21 = scalar_select %p695_p4, 1, 0 }
   0xc   : > { %s873_s22 = scalar_select %p700_p6, 1, 0 }
   0xd   : > { %p705_p8 = pnand %p405_p5, %p141_p7  ;;  %s153_s25 = sshll.u32 %s629_s24, 4  ;;  %s154_s25 = int_to_ptr.vmem [resolvable:$true] %s153_s25 }
   0xe   : > { %s718_s27 = sadd.s32 1, %s627_s18   ;;  %s28_s28 = sadd.s32 1, %s623_s17 }
   0xf   : > { %s874_s23 = scalar_select %p705_p8, 1, 0 }
  0x10   : > { %p441_p9 = pneg %p705_p8  ;;  %s25_s29 = ssub.s32 %s627_s18, %s718_s27 }
  0x11   : > { %s499_s6 = scalar_lea.hbm %s865_s1, 128 }
  0x12   : > { %p713_p10 = pnand %p441_p9, %p869_p1  ;;  %p500_p11 = scmp.ne.s32.totalorder %s865_s1, %s499_s6 }
  0x13   : > { %p506_p3 = scmp.lt.u32.totalorder %s499_s6, %s865_s1 }
  0x14   : > { %p501_p12 = pneg %p713_p10 }
  0x16   : > { %p502_p13 = pnand %p501_p12, %p500_p11 }
  0x18   : > { %p503_p0 = pneg %p502_p13 }
  0x1a   : > { %p508_p5 = pnand %p506_p3, %p503_p0 }
  0x1c   : > { %511 = shalt.err (!%p508_p5)
}
  0x1d   : > { %s512_s11 = scalar_lea.vmem %s154_s25, 128  ;;  %p520_p2 = scmp.lt.s32.totalorder %s154_s25, %s154_s25 }
  0x1e   : > { %p513_p7 = scmp.ne.s32.totalorder %s154_s25, %s512_s11  ;;  %p521_p6 = scmp.lt.s32.totalorder %s512_s11, %s512_s11 }
  0x20   : > { %p515_p9 = pnand %p513_p7, %p501_p12  ;;  %p522_p4 = por %p521_p6, %p520_p2 }
  0x22   : > { %p516_p1 = pneg %p515_p9 }
  0x24   : > { %p523_p8 = pnand %p522_p4, %p516_p1 }
  0x26   : > { %526 = shalt.err (!%p523_p8)
}
  0x27   : > { %s630_s12 = smov 64   ;;  %s631_s13 = smov 4  }
  0x28   : > { %444 = dma.hbm_to_vmem [thread:$0]  (!%p713_p10), %s865_s1, 128, %s154_s25, [#allocation6], %s630_s12, %s630_s12, %s631_s13  }
  0x29   : > { %p26_p11 = scmp.eq.s32.totalorder %s25_s29, 0  ;;  %p35_p2 = scmp.ne.s32.totalorder %s623_s17, %s619_s16 }
  0x2a   : > { %p36_p1 = scmp.eq.s32.totalorder %s627_s18, 0  ;;  %p454_p4 = scmp.lt.s32.totalorder %s627_s18, 4 }
  0x2b   : > { %s744_s24 = scalar_select %p26_p11, %s623_s17, %s28_s28  }
  0x2c   : > { %p37_p6 = por %p36_p1, %p35_p2  ;;  %p876_p8 = scmp.eq.s32.totalorder %s686_s19, 3 }
  0x2d   : > { %s173_s5 = sand.u32 1, %s623_s17   ;;  %s423_s6 = sshll.u32 %s627_s18, 8 }
  0x2e   : > { %p748_p12 = por %p876_p8, %p35_p2  ;;  %s408_s7 = sshll.u32 %s173_s5, 4 }
  0x2f   : > { %s757_s9 = scalar_lea.hbm %s864_s0, %s423_s6  ;;  %s177_s25 = scalar_lea.vmem [#allocation2], %s408_s7 }
  0x30   : > { %s184_s28 = sshll.u32 %s177_s25, 4  ;;  %p759_p10 = pnand %p454_p4, %p37_p6  ;;  %s763_s28 = int_to_ptr.vmem [resolvable:$true] %s184_s28 }
  0x31   : > { %s765_s10 = scalar_lea.sflag [#allocation3], %s173_s5  ;;  %s527_s11 = scalar_lea.hbm %s757_s9, 256 }
  0x32   : > { %p528_p13 = scmp.ne.s32.totalorder %s757_s9, %s527_s11  ;;  %p529_p0 = pneg %p759_p10 }
  0x33   : > { %s532_s14 = scalar_lea.hbm %s864_s0, 1024  ;;  %p533_p7 = scmp.lt.u32.totalorder %s757_s9, %s864_s0 }
  0x34   : > { %p530_p3 = pnand %p529_p0, %p528_p13  ;;  %p534_p9 = scmp.lt.u32.totalorder %s532_s14, %s527_s11 }
  0x35   : > { %p536_p2 = scmp.lt.u32.totalorder %s527_s11, %s757_s9 }
  0x36   : > { %p531_p5 = pneg %p530_p3  ;;  %p535_p11 = por %p534_p9, %p533_p7 }
  0x38   : > { %p537_p1 = por %p536_p2, %p535_p11 }
  0x3a   : > { %p538_p4 = pnand %p537_p1, %p531_p5 }
  0x3c   : > { %541 = shalt.err (!%p538_p4)
}
  0x3d   : > { %s542_s5 = scalar_lea.vmem %s763_s28, 256  ;;  %s632_s7 = smov [#allocation2]  }
  0x3e   : > { %p543_p6 = scmp.ne.s32.totalorder %s763_s28, %s542_s5  ;;  %s547_s26 = sshll.u32 %s632_s7, 4  ;;  %s548_s26 = int_to_ptr.vmem [resolvable:$false] %s547_s26 }
  0x3f   : > { %s549_s8 = scalar_lea.vmem %s548_s26, 512  ;;  %p550_p3 = scmp.lt.s32.totalorder %s763_s28, %s548_s26 }
  0x40   : > { %p545_p8 = pnand %p543_p6, %p529_p0  ;;  %p551_p7 = scmp.lt.s32.totalorder %s549_s8, %s542_s5 }
  0x42   : > { %p546_p13 = pneg %p545_p8  ;;  %p552_p9 = por %p551_p7, %p550_p3 }
  0x44   : > { %p553_p11 = pnand %p552_p9, %p546_p13 }
  0x46   : > { %556 = shalt.err (!%p553_p11)
}
  0x47   : > { %s633_s25 = smov 128   ;;  %s634_s11 = smov 8  }
  0x48   : > { %448 = dma.hbm_to_vmem [thread:$0]  (!%p759_p10), %s757_s9, 256, %s763_s28, %s765_s10, %s633_s25, %s633_s25, %s634_s11  }
  0x49   : > { %p879_p0 = scmp.ne.s32.totalorder %s874_s23, 0 }
  0x4a   : > { %s796_s12 = sand.u32 (!%p879_p0), 1, %s619_s16   ;;  %p880_p5 = scmp.ne.s32.totalorder (!%p879_p0), %s872_s21, 0 }
  0x4b   : > { %196 = sbr.rel (%p879_p0) target bundleno = 326 (0x146), region = 36  ;;  %s412_s13 = sshll.u32 (!%p879_p0), %s796_s12, 4 }
  0x4c   : > { %s199_s14 = scalar_lea.sflag (!%p879_p0), [#allocation3], %s796_s12  ;;  %s202_s20 = scalar_lea.vmem (!%p879_p0), [#allocation2], %s412_s13 }
  0x52   : > { %602 = dma.done.wait (%p880_p5), %s199_s14, 256  }
  0x53   : > { %604 = vsyncadd (%p880_p5), %s199_s14, 4294967040  ;;  %p881_p2 = scmp.eq.s32.totalorder %s686_s19, 0 }
  0x55   : > { %606 = dma.done.wait (%p881_p2), [#allocation6], 128   ;;  %p882_p10 = pmov %p881_p2 }
  0x56   : > { %v635_v0 = vmov 0.0   ;;  %vm636_vm0 = vmmov 0   ;;  %v498_v1 = vld [vmem:[#allocation5] sm:$0xff]   ;;  %v235_v3 = vld [vmem:[%s202_s20 + $0x8] sm:$0xff]  ;;  %vm245_vm1 = vcmask 130048   ;;  %s414_s21 = sshll.u32 %s796_s12, 3 }
  0x57   : > { %608 = vsyncadd (%p882_p10), [#allocation6], 4294967168  ;;  %427 = vmatprep.subr.bf16.mxu0 %v635_v0  ;;  %429 = vmatprep.mubr.msk.bf16.mxu0 %vm636_vm0, %v635_v0  ;;  %v234_v2 = vld [vmem:[%s202_s20] sm:$0xff]  ;;  %s424_s10 = sshll.u32 %s686_s19, 7  ;;  %s230_s6 = scalar_lea.vmem [#allocation7], %s414_s21  ;;  %vm304_vm2 = vcmask 257024  }
  0x58   : > { %428 = vmatpush3.bf16.msra.mxu0 %v498_v1  ;;  %v236_v4 = vpack.c.bf16 %v235_v3, %v234_v2  ;;  %v417_v5 = vld [vmem:[%s866_s2] ss:$0 sm:$0xff]  ;;  %s321_s5 = sshll.u32 %s230_s6, 4  ;;  %s819_s8 = scalar_lea.hbm %s868_s4, %s424_s10  ;;  %s821_s5 = int_to_ptr.vmem [resolvable:$true] %s321_s5 }
  0x59   : > { %v299_v7 = vld [vmem:[%s867_s3] sm:$0xff]  ;;  %s308_s25 = scalar_lea.sflag [#allocation4], %s796_s12  ;;  %s557_s19 = scalar_lea.vmem %s821_s5, 128 }
  0x5a   : > { %p558_p1 = scmp.ne.s32.totalorder %s821_s5, %s557_s19  ;;  %s637_s11 = smov [#allocation7]  }
  0x5b   : > { %430 = vmatmul.mubr.msk.bf16.vlgmr.msra.gmra.mrb[0].mxu0 %vm245_vm1, %v236_v4  ;;  %s561_s13 = sshll.u32 %s637_s11, 4  ;;  %s562_s13 = int_to_ptr.vmem [resolvable:$false] %s561_s13 }
  0x5c   : > { %p559_p4 = pnand %p558_p1, %p748_p12  ;;  %s563_s14 = scalar_lea.vmem %s562_s13, 256 }
  0x5d   : > { %p564_p8 = scmp.lt.s32.totalorder %s821_s5, %s562_s13  ;;  %p565_p13 = scmp.lt.s32.totalorder %s563_s14, %s557_s19 }
  0x5e   : > { %p560_p6 = pneg %p559_p4 }
  0x5f   : > { %p566_p3 = por %p565_p13, %p564_p8 }
  0x61   : > { %p567_p7 = pnand %p566_p3, %p560_p6 }
 0x12e   : > { %v283_v6 = vpop.f32.mrb[0].mxu0 }
 0x12f   : > { %v297_v8 = vadd.f32 %v417_v5, %v283_v6  ;;  %v431_v9 = vpop.f32.mrb[1].mxu0 }
 0x130   : > { %v286_v10 = vpop.f32.mrb[2].mxu0 }
 0x131   : > { %v300_v11 = vadd.f32 %v299_v7, %v297_v8  ;;  %v298_v12 = vadd.f32 %v417_v5, %v286_v10  ;;  %v432_v13 = vpop.f32.mrb[3].mxu0 }
 0x133   : > { %v302_v14 = vpack.c.bf16 %v300_v11, %v300_v11  ;;  %v301_v15 = vadd.f32 %v299_v7, %v298_v12 }
 0x135   : > { %305 = vst.msk [vmem:[%s230_s6] sm:$0xf] %vm304_vm2, %v302_v14  ;;  %v303_v16 = vpack.c.bf16 %v301_v15, %v301_v15 }
 0x137   : > { %306 = vst.msk [vmem:[%s230_s6 + $0x4] sm:$0xf] %vm304_vm2, %v303_v16 }
 0x138   : > { %570 = shalt.err (!%p567_p7)
}
 0x139   : > { %s571_s20 = scalar_lea.hbm %s819_s8, 128  ;;  %s575_s9 = scalar_lea.hbm %s868_s4, 512 }
 0x13a   : > { %p572_p9 = scmp.ne.s32.totalorder %s819_s8, %s571_s20  ;;  %p576_p5 = scmp.lt.u32.totalorder %s819_s8, %s868_s4 }
 0x13b   : > { %p577_p2 = scmp.lt.u32.totalorder %s575_s9, %s571_s20  ;;  %p579_p1 = scmp.lt.u32.totalorder %s571_s20, %s819_s8 }
 0x13c   : > { %p573_p11 = pnand %p572_p9, %p748_p12 }
 0x13d   : > { %p578_p10 = por %p577_p2, %p576_p5 }
 0x13e   : > { %p574_p0 = pneg %p573_p11 }
 0x13f   : > { %p580_p4 = por %p579_p1, %p578_p10 }
 0x141   : > { %p581_p6 = pnand %p580_p4, %p574_p0 }
 0x143   : > { %584 = shalt.err (!%p581_p6)
}
 0x144   : > { %s638_s10 = smov 64   ;;  %s639_s6 = smov 4  }
 0x145   : > { %439 = dma.vmem_to_hbm [thread:$0]  (%p748_p12), %s821_s5, 128, %s819_s8, %s308_s25, %s638_s10, %s638_s10, %s639_s6  }
 0x146 PF: > { %p456_p8 = scmp.ge.s32.totalorder %s627_s18, 2  ;;  %s336_s7 = sand.u32 1, %s615_s15  }
 0x147   : > { %p883_p13 = scmp.ne.s32.totalorder %s873_s22, 0  ;;  %s337_s26 = scalar_lea.sflag [#allocation4], %s336_s7 }
 0x149   : > { %p450_p3 = pnand %p456_p8, %p883_p13 }
 0x14b   : > { %610 = dma.done.wait (!%p450_p3), %s337_s26, 128  }
 0x14c   : > { %612 = vsyncadd (!%p450_p3), %s337_s26, 4294967168  ;;  %p18_p7 = scmp.ge.s32.totalorder %s718_s27, 6   ;;  %s884_s15 = smov %s619_s16 }
 0x14d   : > { %s885_s16 = smov %s623_s17  ;;  %s886_s17 = smov %s744_s24 }
 0x14e   : > { %s887_s18 = smov %s718_s27  ;;  %20 = sbr.rel (!%p18_p7) target bundleno = 6 (0x6), region = 85 }
 0x155   :  { %342 = vsyncpa [#allocation3], 1 }
 0x156   :  { %344 = vsyncpa [#allocation3 + $0x1], 1 }
 0x157   :  { %345 = vsyncpa [#allocation6], 1 }
 0x158   :  { %346 = vsyncpa [#allocation4], 1 }
 0x159   :  { %348 = vsyncpa [#allocation4 + $0x1], 1 }

</bundles_post_ra>
